<compile_context>
chip_gen: v7x
topology: tpu7x:2x2x1
jax: 0.10.0
libtpu: 0.0.40
codegen_flags: <defaults>
</compile_context>

<pallas_src>
import functools
import math

import jax
import jax.numpy as jnp
from jax.experimental import pallas as pl
from jax.experimental.pallas import tpu as pltpu


def _relation_aware_kernel(src_ref, dst_ref, wsrc_ref, wdst_ref, c_ref,
                           out_ref):
    # src_ref/dst_ref: (tm, Wk) lane-dense packed edge rows (pack edges/row).
    # wsrc_ref/wdst_ref: (Wk, 128) block-diagonal prefused weights
    #   (grid-constant -> fetched once, stay resident); only columns
    #   0..pack-1 are non-zero.
    # c_ref: (1,) prefused scalar bias in SMEM.
    # out_ref: (tm, pack) packed scores.
    pack = out_ref.shape[-1]
    # Two MXU matmuls do the whole per-edge contraction (f32 in / f32 acc);
    # no XLU lane-reduce, no VPU broadcast-multiply.
    s = jnp.dot(src_ref[...], wsrc_ref[...], preferred_element_type=jnp.float32)
    s = s + jnp.dot(dst_ref[...], wdst_ref[...],
                    preferred_element_type=jnp.float32)
    # Keep only the meaningful score columns, add bias (SMEM scalar), tanh (EUP).
    out_ref[...] = jnp.tanh(s[:, :pack] + c_ref[0])


@functools.partial(jax.jit, static_argnames=("tm",))
def relation_aware(src, dst, wd, bd, wf, bf, *, tm=8192):
    """src, dst: (E, 2*input_dim) f32.  wd: (2*input_dim, output_dim),
    bd: (1, output_dim), wf: (3*output_dim, 1), bf: (1, 1).
    Returns tanh edge scores of shape (E,)."""
    E, two_in = src.shape
    out_dim = wd.shape[1]

    # ---- Inference-mode algebraic prefusion (tiny, runs once in XLA) ----
    wf1 = wf[:out_dim, 0]
    wf2 = wf[out_dim:2 * out_dim, 0]
    wf3 = wf[2 * out_dim:, 0]
    v_src = wf1 + wf3                                   # (out_dim,)
    v_dst = wf2 - wf3
    # Pure f32 elementwise contractions for the prefusion itself.
    w_src_vec = (wd * v_src[None, :]).sum(axis=1)       # (two_in,)
    w_dst_vec = (wd * v_dst[None, :]).sum(axis=1)
    c = ((bd[0] * (wf1 + wf2)).sum() + bf[0, 0]).reshape(1)

    # ---- Lane-dense packing: pack edges per 128-lane-multiple row ----
    pack = 128 // math.gcd(two_in, 128)                 # pack*two_in % 128 == 0
    wk = pack * two_in
    e_pad = ((E + pack - 1) // pack) * pack
    if e_pad != E:                                      # only the ragged case copies
        src = jnp.pad(src, ((0, e_pad - E), (0, 0)))
        dst = jnp.pad(dst, ((0, e_pad - E), (0, 0)))
    rows = e_pad // pack
    src_p = src.reshape(rows, wk)                       # free row-major reshape
    dst_p = dst.reshape(rows, wk)

    # Block-diagonal prefused weights: W[j*two_in + k, j] = w_vec[k],
    # zero elsewhere; lane-padded to 128 output columns (MXU-friendly N).
    def _block_weight(w_vec):
        eye = jnp.eye(pack, dtype=jnp.float32)                       # (pack, pack)
        blk = (eye[:, None, :] * w_vec[None, :, None]).reshape(wk, pack)
        if pack < 128:
            blk = jnp.pad(blk, ((0, 0), (0, 128 - pack)))
        return blk
    w_src_blk = _block_weight(w_src_vec)
    w_dst_blk = _block_weight(w_dst_vec)

    # ---- Row tiling: big DMA steps, >=2 balanced steps, VMEM-capped ----
    rows8 = max(8, ((rows + 7) // 8) * 8)
    vmem_cap_rows = max(8, ((4 * 1024 * 1024) // (wk * 4)) // 8 * 8)  # 4 MiB/input
    tm_req = max(8, min((tm // 8) * 8, vmem_cap_rows))
    half = ((rows8 + 15) // 16) * 8      # ~rows/2, multiple of 8 -> >=2 grid steps
    tm_eff = max(8, min(tm_req, half))
    grid = pl.cdiv(rows, tm_eff)

    out = pl.pallas_call(
        _relation_aware_kernel,
        out_shape=jax.ShapeDtypeStruct((rows, pack), jnp.float32),
        grid_spec=pltpu.PrefetchScalarGridSpec(
            num_scalar_prefetch=0,
            grid=(grid,),
            in_specs=[
                pl.BlockSpec((tm_eff, wk), lambda i: (i, 0)),      # packed src rows
                pl.BlockSpec((tm_eff, wk), lambda i: (i, 0)),      # packed dst rows
                pl.BlockSpec((wk, 128), lambda i: (0, 0)),         # src block weight
                pl.BlockSpec((wk, 128), lambda i: (0, 0)),         # dst block weight
                pl.BlockSpec(memory_space=pltpu.MemorySpace.SMEM), # fused bias
            ],
            out_specs=pl.BlockSpec((tm_eff, pack), lambda i: (i, 0)),
        ),
        compiler_params=pltpu.CompilerParams(
            dimension_semantics=("parallel",),
            vmem_limit_bytes=40 * 1024 * 1024),
    )(src_p, dst_p, w_src_blk, w_dst_blk, c)

    # Packed (rows, pack) -> (E,) scores; padded/garbage tail rows sliced off.
    return out.reshape(e_pad)[:E]


def _reference(src, dst, wd, bd, wf, bf):
    hp = jax.lax.Precision.HIGHEST
    src_h = jnp.dot(src, wd, precision=hp) + bd
    dst_h = jnp.dot(dst, wd, precision=hp) + bd
    diff = src_h - dst_h
    e = jnp.concatenate([src_h, dst_h, diff], axis=1)
    return jnp.tanh((jnp.dot(e, wf, precision=hp) + bf)[:, 0])


if __name__ == "__main__":
    # Small shapes consistent with the module: input_dim=16 -> src/dst have
    # 2*input_dim=32 features; output_dim=32.
    input_dim = 16
    output_dim = 32

    key = jax.random.PRNGKey(0)
    k_wd, k_bd, k_wf, k_bf, k_data = jax.random.split(key, 5)

    # Deterministic PyTorch-style Linear init: U(-1/sqrt(fan_in), 1/sqrt(fan_in)).
    bd_bound = 1.0 / (2 * input_dim) ** 0.5
    wd = jax.random.uniform(k_wd, (2 * input_dim, output_dim),
                            minval=-bd_bound, maxval=bd_bound, dtype=jnp.float32)
    bd = jax.random.uniform(k_bd, (1, output_dim),
                            minval=-bd_bound, maxval=bd_bound, dtype=jnp.float32)
    bf_bound = 1.0 / (3 * output_dim) ** 0.5
    wf = jax.random.uniform(k_wf, (3 * output_dim, 1),
                            minval=-bf_bound, maxval=bf_bound, dtype=jnp.float32)
    bf = jax.random.uniform(k_bf, (1, 1),
                            minval=-bf_bound, maxval=bf_bound, dtype=jnp.float32)

    # E=64: even packing; E=61: pad/tail path; E=200: multi-step ragged grid.
    for E in (64, 61, 200):
        k_src, k_dst, k_data = jax.random.split(k_data, 3)
        src = jax.random.normal(k_src, (E, 2 * input_dim), dtype=jnp.float32)
        dst = jax.random.normal(k_dst, (E, 2 * input_dim), dtype=jnp.float32)
        ref = _reference(src, dst, wd, bd, wf, bf)
        for tile in (8192, 8):   # default big tile and an explicit multi-step grid
            score = jax.block_until_ready(
                relation_aware(src, dst, wd, bd, wf, bf, tm=tile))
            assert score.shape == (E,)
            err = jnp.max(jnp.abs(score - ref))
            assert jnp.allclose(score, ref, atol=1e-4, rtol=1e-4), (
                f"E={E} tm={tile}: max err {err}")
    print("KERNEL_OK")
</pallas_src>

<mosaic_0001>
module attributes {stable_mosaic.version = 11 : i64} {
  func.func @_relation_aware_kernel(%arg0: i32, %arg1: memref<8x128xf32, #tpu.memory_space<vmem>>, %arg2: memref<8x128xf32, #tpu.memory_space<vmem>>, %arg3: memref<128x128xf32, #tpu.memory_space<vmem>>, %arg4: memref<128x128xf32, #tpu.memory_space<vmem>>, %arg5: memref<1xf32, #tpu.memory_space<smem>>, %arg6: memref<8x4xf32, #tpu.memory_space<vmem>>) attributes {dimension_semantics = [#tpu.dimension_semantics<parallel>], iteration_bounds = array<i64: 2>, scalar_prefetch = 0 : i64, scratch_operands = 0 : i64, tpu.core_type = #tpu.core_type<tc>, window_params = [{transform_indices = @transform_0, window_bounds = array<i64: 8, 128>}, {transform_indices = @transform_1, window_bounds = array<i64: 8, 128>}, {pipeline_mode = #tpu.pipeline_mode<synchronous>, transform_indices = @transform_2, window_bounds = array<i64: 128, 128>}, {pipeline_mode = #tpu.pipeline_mode<synchronous>, transform_indices = @transform_3, window_bounds = array<i64: 128, 128>}, {transform_indices = @transform_4, window_bounds = array<i64: 1>}, {transform_indices = @transform_5, window_bounds = array<i64: 8, 4>}]} {
    %c0 = arith.constant 0 : index
    %c0_0 = arith.constant 0 : index
    %0 = vector.load %arg1[%c0, %c0_0] : memref<8x128xf32, #tpu.memory_space<vmem>>, vector<8x128xf32>
    %c0_1 = arith.constant 0 : index
    %c0_2 = arith.constant 0 : index
    %1 = vector.load %arg3[%c0_1, %c0_2] : memref<128x128xf32, #tpu.memory_space<vmem>>, vector<128x128xf32>
    %cst = arith.constant dense<0.000000e+00> : vector<8x128xf32>
    %2 = tpu.matmul %0, %1, %cst {dimension_numbers = #tpu.dot_dimension_numbers<[1], [0], [0], [1], [0, 0, 1, 1], [], []>} : vector<8x128xf32>, vector<128x128xf32>, vector<8x128xf32> -> vector<8x128xf32>
    %c0_3 = arith.constant 0 : index
    %c0_4 = arith.constant 0 : index
    %3 = vector.load %arg2[%c0_3, %c0_4] : memref<8x128xf32, #tpu.memory_space<vmem>>, vector<8x128xf32>
    %c0_5 = arith.constant 0 : index
    %c0_6 = arith.constant 0 : index
    %4 = vector.load %arg4[%c0_5, %c0_6] : memref<128x128xf32, #tpu.memory_space<vmem>>, vector<128x128xf32>
    %cst_7 = arith.constant dense<0.000000e+00> : vector<8x128xf32>
    %5 = tpu.matmul %3, %4, %cst_7 {dimension_numbers = #tpu.dot_dimension_numbers<[1], [0], [0], [1], [0, 0, 1, 1], [], []>} : vector<8x128xf32>, vector<128x128xf32>, vector<8x128xf32> -> vector<8x128xf32>
    %6 = arith.addf %2, %5 : vector<8x128xf32>
    %7 = vector.extract_strided_slice %6 {offsets = [0, 0], sizes = [8, 4], strides = [1, 1]} : vector<8x128xf32> to vector<8x4xf32>
    %c0_8 = arith.constant 0 : index
    %8 = memref.load %arg5[%c0_8] : memref<1xf32, #tpu.memory_space<smem>>
    %9 = vector.broadcast %8 : f32 to vector<8x4xf32>
    %10 = arith.addf %7, %9 : vector<8x4xf32>
    %11 = math.tanh %10 : vector<8x4xf32>
    %c0_9 = arith.constant 0 : index
    %c0_10 = arith.constant 0 : index
    %12 = vector.load %arg6[%c0_9, %c0_10] : memref<8x4xf32, #tpu.memory_space<vmem>>, vector<8x4xf32>
    tpu.vector_store %arg6[%c0_9, %c0_10], %11 {strides = array<i32>} : memref<8x4xf32, #tpu.memory_space<vmem>>, vector<8x4xf32>,
    return
  }
  func.func @transform_0(%arg0: i32) -> (i32, i32) {
    %c0_i32 = arith.constant 0 : i32
    %c0_i32_0 = arith.constant 0 : i32
    return %arg0, %c0_i32 : i32, i32
  }
  func.func @transform_1(%arg0: i32) -> (i32, i32) {
    %c0_i32 = arith.constant 0 : i32
    %c0_i32_0 = arith.constant 0 : i32
    return %arg0, %c0_i32 : i32, i32
  }
  func.func @transform_2(%arg0: i32) -> (i32, i32) {
    %c0_i32 = arith.constant 0 : i32
    %c0_i32_0 = arith.constant 0 : i32
    %c0_i32_1 = arith.constant 0 : i32
    return %c0_i32, %c0_i32_0 : i32, i32
  }
  func.func @transform_3(%arg0: i32) -> (i32, i32) {
    %c0_i32 = arith.constant 0 : i32
    %c0_i32_0 = arith.constant 0 : i32
    %c0_i32_1 = arith.constant 0 : i32
    return %c0_i32, %c0_i32_0 : i32, i32
  }
  func.func @transform_4(%arg0: i32) -> i32 {
    %c0_i32 = arith.constant 0 : i32
    %c0_i32_0 = arith.constant 0 : i32
    return %c0_i32 : i32
  }
  func.func @transform_5(%arg0: i32) -> (i32, i32) {
    %c0_i32 = arith.constant 0 : i32
    %c0_i32_0 = arith.constant 0 : i32
    return %arg0, %c0_i32 : i32, i32
  }
}

</mosaic_0001>

<bundles_post_ra>
// kernel: relation_aware.1
= control target key start
LH: loop header
LB: loop body
LE: loop exit
PB: predicated region body
PF: predicated region fallthrough
CT: control target
= control target key end

     0   :  { %s702_s20 = smov 0   ;;  %s838_s0 = inlined_call_operand.vmem [shape: f32[16,128], index: 0, kind: input, shape index: {}]   ;;  %s839_s1 = inlined_call_operand.vmem [shape: f32[16,128], index: 1, kind: input, shape index: {}]   ;;  %s840_s2 = inlined_call_operand.vmem [shape: f32[128,128], index: 2, kind: input, shape index: {}]   ;;  %s841_s3 = inlined_call_operand.vmem [shape: f32[128,128], index: 3, kind: input, shape index: {}]   ;;  %s842_s4 = inlined_call_operand.<no memory space> [shape: f32[1], index: 4, kind: input, shape index: {}]   ;;  %s843_s5 = inlined_call_operand.vmem [shape: f32[16,4], index: 5, kind: output, shape index: {}]  }
   0x1   :  { %10 = sst [smem:[#allocation2]] %s842_s4 }
   0x2 LB: > { %s483_s21 = sadd.s32 4294967295, %s664_s20   ;;  %p487_p0 = scmp.ge.s32.totalorder %s664_s20, 1  ;;  %s664_s20 = sphi %s702_s20, %s16_s20  }
   0x3   : > { %p196_p1 = scmp.lt.s32.totalorder %s664_s20, 3 }
   0x5   : > { %p197_p2 = pnand %p487_p0, %p196_p1 }
   0x6   : > { %v256_v0 = vld [vmem:[%s841_s3] sm:$0xff] (!%p197_p2)  ;;  %v257_v1 = vld [vmem:[%s841_s3 + $0x8] sm:$0xff] (!%p197_p2)  ;;  %v666_v3 = vmov (!%p197_p2), 0.0|0.0   ;;  %v258_v6 = vld [vmem:[%s841_s3 + $0x10] sm:$0xff] (!%p197_p2)  ;;  %vm667_vm0 = vmmov (!%p197_p2), 0   ;;  %v668_v11 = vmov (!%p197_p2), 0.0  }
   0x7   : > { %200 = sbr.rel (%p197_p2) target bundleno = 269 (0x10d), region = 40  ;;  %v239_v2 = vld [vmem:[%s840_s2] sm:$0xff] (!%p197_p2)  ;;  %597 = vmatprep.subr.bf16.mxu0 (!%p197_p2), %v666_v3  ;;  %621 = vmatprep.subr.bf16.mxu1 (!%p197_p2), %v666_v3  ;;  %v598_v4 = vpack.c.bf16 (!%p197_p2), %v257_v1, %v256_v0  ;;  %v240_v5 = vld [vmem:[%s840_s2 + $0x8] sm:$0xff] (!%p197_p2)  ;;  %v259_v7 = vld [vmem:[%s841_s3 + $0x18] sm:$0xff] (!%p197_p2)  ;;  %p226_p3 = scmp.lt.s32.totalorder (!%p197_p2), %s483_s21, 1  ;;  %vm416_vm1 = vcmask (!%p197_p2), 31744  }
   0x8   : > { %v622_v8 = vpack.c.bf16 (!%p197_p2), %v240_v5, %v239_v2  ;;  %v241_v9 = vld [vmem:[%s840_s2 + $0x10] sm:$0xff] (!%p197_p2)  ;;  %v242_v10 = vld [vmem:[%s840_s2 + $0x18] sm:$0xff] (!%p197_p2)  ;;  %559 = vmatprep.mubr.msk.f32.mxu0 (!%p197_p2), %vm667_vm0, %v668_v11  ;;  %594 = vmatprep.mubr.msk.f32.mxu1 (!%p197_p2), %vm667_vm0, %v668_v11  ;;  %v601_v12 = vpack.c.bf16 (!%p197_p2), %v259_v7, %v258_v6  ;;  %v260_v14 = vld [vmem:[%s841_s3 + $0x20] sm:$0xff] (!%p197_p2) }
   0x9   : > { %599 = vmatpush3.bf16.msra.mxu0 (!%p197_p2), %v598_v4  ;;  %v625_v13 = vpack.c.bf16 (!%p197_p2), %v242_v10, %v241_v9  ;;  %v261_v15 = vld [vmem:[%s841_s3 + $0x28] sm:$0xff] (!%p197_p2)  ;;  %v243_v16 = vld [vmem:[%s840_s2 + $0x20] sm:$0xff] (!%p197_p2)  ;;  %v262_v20 = vld [vmem:[%s841_s3 + $0x30] sm:$0xff] (!%p197_p2) }
   0xa   : > { %623 = vmatpush3.bf16.msra.mxu1 (!%p197_p2), %v622_v8  ;;  %600 = vmatprep.subr.bf16.mxu0 (!%p197_p2), %v666_v3  ;;  %v244_v17 = vld [vmem:[%s840_s2 + $0x28] sm:$0xff] (!%p197_p2)  ;;  %v604_v18 = vpack.c.bf16 (!%p197_p2), %v261_v15, %v260_v14  ;;  %v263_v21 = vld [vmem:[%s841_s3 + $0x38] sm:$0xff] (!%p197_p2)  ;;  %v245_v22 = vld [vmem:[%s840_s2 + $0x30] sm:$0xff] (!%p197_p2) }
   0xb   : > { %624 = vmatprep.subr.bf16.mxu1 (!%p197_p2), %v666_v3  ;;  %v628_v19 = vpack.c.bf16 (!%p197_p2), %v244_v17, %v243_v16  ;;  %v246_v23 = vld [vmem:[%s840_s2 + $0x38] sm:$0xff] (!%p197_p2)  ;;  %v607_v24 = vpack.c.bf16 (!%p197_p2), %v263_v21, %v262_v20  ;;  %v264_v26 = vld [vmem:[%s841_s3 + $0x40] sm:$0xff] (!%p197_p2)  ;;  %v265_v27 = vld [vmem:[%s841_s3 + $0x48] sm:$0xff] (!%p197_p2) }
   0xc   : > { %v631_v25 = vpack.c.bf16 (!%p197_p2), %v246_v23, %v245_v22  ;;  %v247_v28 = vld [vmem:[%s840_s2 + $0x40] sm:$0xff] (!%p197_p2)  ;;  %v248_v29 = vld [vmem:[%s840_s2 + $0x48] sm:$0xff] (!%p197_p2)  ;;  %v610_v30 = vpack.c.bf16 (!%p197_p2), %v265_v27, %v264_v26  ;;  %v266_v32 = vld [vmem:[%s841_s3 + $0x50] sm:$0xff] (!%p197_p2) }
   0xd   : > { %602 = vmatpush3.bf16.msra.mxu0 (!%p197_p2), %v601_v12  ;;  %v634_v31 = vpack.c.bf16 (!%p197_p2), %v248_v29, %v247_v28  ;;  %v267_v33 = vld [vmem:[%s841_s3 + $0x58] sm:$0xff] (!%p197_p2)  ;;  %v249_v34 = vld [vmem:[%s840_s2 + $0x50] sm:$0xff] (!%p197_p2)  ;;  %v268_v38 = vld [vmem:[%s841_s3 + $0x60] sm:$0xff] (!%p197_p2) }
   0xe   : > { %626 = vmatpush3.bf16.msra.mxu1 %v625_v13  ;;  %603 = vmatprep.subr.bf16.mxu0 %v666_v3  ;;  %v250_v35 = vld [vmem:[%s840_s2 + $0x58] sm:$0xff]  ;;  %v613_v36 = vpack.c.bf16 %v267_v33, %v266_v32  ;;  %v269_v39 = vld [vmem:[%s841_s3 + $0x68] sm:$0xff]  ;;  %v251_v40 = vld [vmem:[%s840_s2 + $0x60] sm:$0xff]  ;;  %s845_s21 = smov (!%p226_p3, %s483_s21), 1 }
   0xf   : > { %627 = vmatprep.subr.bf16.mxu1 %v666_v3  ;;  %v637_v37 = vpack.c.bf16 %v250_v35, %v249_v34  ;;  %v252_v41 = vld [vmem:[%s840_s2 + $0x68] sm:$0xff]  ;;  %v616_v42 = vpack.c.bf16 %v269_v39, %v268_v38  ;;  %v270_v44 = vld [vmem:[%s841_s3 + $0x70] sm:$0xff]  ;;  %v271_v45 = vld [vmem:[%s841_s3 + $0x78] sm:$0xff]  ;;  %s488_s12 = sshll.u32 %s845_s21, 3  ;;  %s412_s21 = sld [smem:[#allocation2]] }
  0x10   : > { %v640_v43 = vpack.c.bf16 %v252_v41, %v251_v40  ;;  %v253_v46 = vld [vmem:[%s840_s2 + $0x70] sm:$0xff]  ;;  %v254_v47 = vld [vmem:[%s840_s2 + $0x78] sm:$0xff]  ;;  %v619_v48 = vpack.c.bf16 %v271_v45, %v270_v44  ;;  %s233_s15 = scalar_lea.vmem %s839_s1, %s488_s12  ;;  %s229_s18 = scalar_lea.vmem %s838_s0, %s488_s12 }
  0x11   : > { %605 = vmatpush3.bf16.msra.mxu0 %v604_v18  ;;  %v643_v49 = vpack.c.bf16 %v254_v47, %v253_v46  ;;  %v255_v50 = vld [vmem:[%s233_s15] sm:$0xff]  ;;  %s237_s23 = scalar_lea.vmem %s843_s5, %s488_s12 }
  0x12   : > { %629 = vmatpush3.bf16.msra.mxu1 %v628_v19  ;;  %606 = vmatprep.subr.bf16.mxu0 %v666_v3  ;;  %v238_v51 = vld [vmem:[%s229_s18] sm:$0xff] }
  0x13   : > { %630 = vmatprep.subr.bf16.mxu1 %v666_v3 }
  0x15   : > { %608 = vmatpush3.bf16.msra.mxu0 %v607_v24  ;;  %v413_v54 = vstv %s412_s21 }
  0x16   : > { %632 = vmatpush3.bf16.msra.mxu1 %v631_v25  ;;  %609 = vmatprep.subr.bf16.mxu0 %v666_v3 }
  0x17   : > { %633 = vmatprep.subr.bf16.mxu1 %v666_v3 }
  0x19   : > { %611 = vmatpush3.bf16.msra.mxu0 %v610_v30 }
  0x1a   : > { %635 = vmatpush3.bf16.msra.mxu1 %v634_v31  ;;  %612 = vmatprep.subr.bf16.mxu0 %v666_v3 }
  0x1b   : > { %636 = vmatprep.subr.bf16.mxu1 %v666_v3 }
  0x1d   : > { %614 = vmatpush3.bf16.msra.mxu0 %v613_v36 }
  0x1e   : > { %638 = vmatpush3.bf16.msra.mxu1 %v637_v37  ;;  %615 = vmatprep.subr.bf16.mxu0 %v666_v3 }
  0x1f   : > { %639 = vmatprep.subr.bf16.mxu1 %v666_v3 }
  0x21   : > { %617 = vmatpush3.bf16.msra.mxu0 %v616_v42 }
  0x22   : > { %641 = vmatpush3.bf16.msra.mxu1 %v640_v43  ;;  %618 = vmatprep.subr.bf16.mxu0 %v666_v3 }
  0x23   : > { %642 = vmatprep.subr.bf16.mxu1 %v666_v3 }
  0x25   : > { %620 = vmatpush3.bf16.msra.mxu0 %v619_v48 }
  0x26   : > { %644 = vmatpush3.bf16.msra.mxu1 %v643_v49 }
  0x28   : > { %560 = vmatmul.mubr.f32.vlgmr.msra.gmra.mrb[0].mxu0 %v255_v50 }
  0x29   : > { %595 = vmatmul.mubr.f32.vlgmr.msra.gmra.mrb[0].mxu1 %v238_v51 }
  0xfb   : > { %v338_v52 = vpop.f32.mrb[0].mxu0 }
  0xfc   : > { %v408_v53 = vpop.f32.mrb[0].mxu1  ;;  %v561_v55 = vpop.f32.mrb[1].mxu0 }
  0xfd   : > { %v409_v56 = vadd.f32 %v408_v53, %v338_v52  ;;  %v596_v57 = vpop.f32.mrb[1].mxu1 }
  0xff   : > { %v414_v58 = vadd.f32 %v413_v54, %v409_v56 }
 0x101   : > { %656 = vtanh.f32 %v414_v58 }
 0x10b   : > { %v657_v59 = vpop.eup %656 }
 0x10c   : > { %417 = vst.msk [vmem:[%s237_s23] sm:$0xff] %vm416_vm1, %v657_v59 }
 0x10d PF: > { %s16_s20 = sadd.s32 1, %s664_s20  }
 0x10e   : > { %p13_p4 = scmp.ge.s32.totalorder %s16_s20, 4  }
 0x110   :  { %15 = sbr.rel (!%p13_p4) target bundleno = 2 (0x2), region = 73 }

</bundles_post_ra>
